<compile_context>
chip_gen: v7x
topology: tpu7x:2x2x1
jax: 0.10.0
libtpu: 0.0.40
codegen_flags: <defaults>
</compile_context>

<pallas_src>
import functools

import jax
import jax.numpy as jnp
from jax import lax
from jax.experimental import pallas as pl
from jax.experimental.pallas import tpu as pltpu


def basic_block_kernel(x_ref, s1_ref, b1_ref, w1_ref, s2_ref, b2_ref, w2_ref,
                       *rest, has_shortcut):
    """One batch image per grid step.

    x_ref  : (1, H, W*Cin)             fused NHWC input (C minor on lanes)
    s*_ref : (1, W*C)                  folded BN scale / bias, tiled over W
    w1_ref : (3, W*Cin,  W*Cout) bf16  conv1 band matrices (one per ky)
    w2_ref : (3, W*Cout, W*Cout) bf16  conv2 band matrices
    wsc_ref: (W*Cin, W*Cout)     bf16  1x1-shortcut band matrix (optional)
    out_ref: (1, H, W*Cout)            lane-dense output
    hbuf   : (H+2, W*Cin)  f32         row-padded relu(bn1(x))
    mbuf   : (H+2, W*Cout) f32         row-padded relu(bn2(conv1))
    """
    if has_shortcut:
        wsc_ref, out_ref, hbuf, mbuf = rest
    else:
        wsc_ref = None
        out_ref, hbuf, mbuf = rest

    _, H, WCin = x_ref.shape
    WCout = out_ref.shape[-1]
    f32 = jnp.float32
    bf16 = jnp.bfloat16

    # ---- bn1 + relu (folded affine), f32 elementwise ----
    h = jnp.maximum(x_ref[0] * s1_ref[...] + b1_ref[...], 0.0)      # (H, W*Cin)

    # ---- residual branch ----
    if has_shortcut:
        # 1x1 conv (stride 1) on relu(bn1(x)) as one block-diagonal matmul.
        res = jnp.dot(h.astype(bf16), wsc_ref[...],
                      preferred_element_type=f32)                   # (H, W*Cout)
    else:
        # identity shortcut uses the ORIGINAL (pre-bn) input (Cin == Cout).
        res = x_ref[0]

    # ---- conv1: 3x3, pad=1, stride=1 as 3 band matmuls ----
    # Only the two halo rows get zeroed (x-padding lives in the band weights).
    hbuf[0:1, :] = jnp.zeros((1, WCin), f32)
    hbuf[H + 1:H + 2, :] = jnp.zeros((1, WCin), f32)
    hbuf[1:H + 1, :] = h

    acc = jnp.zeros((H, WCout), f32)
    for ky in range(3):                                             # static unroll
        acc = acc + jnp.dot(hbuf[ky:ky + H, :].astype(bf16), w1_ref[ky],
                            preferred_element_type=f32)

    # ---- bn2 + relu into the second row-padded buffer ----
    mbuf[0:1, :] = jnp.zeros((1, WCout), f32)
    mbuf[H + 1:H + 2, :] = jnp.zeros((1, WCout), f32)
    mbuf[1:H + 1, :] = jnp.maximum(acc * s2_ref[...] + b2_ref[...], 0.0)

    # ---- conv2: 3x3, pad=1, stride=1 + residual add ----
    acc2 = res
    for ky in range(3):
        acc2 = acc2 + jnp.dot(mbuf[ky:ky + H, :].astype(bf16), w2_ref[ky],
                              preferred_element_type=f32)

    out_ref[0] = acc2.astype(out_ref.dtype)                         # lane-dense store


def _fold_bn(gamma, beta, mean, var, eps=1e-5):
    scale = gamma / jnp.sqrt(var + eps)
    bias = beta - mean * scale
    return scale, bias


def _band_conv3x3(w_hwio, width, dtype=jnp.bfloat16):
    """Fold a 3x3 'same' conv's x-taps (and x zero-padding) into band matrices.

    B[ky, xs*Cin + ci, xo*Cout + co] = w[ky, xs - xo + 1, ci, co]
    (zero where the tap falls outside [0, width)).
    """
    kh, kw, ci, co = w_hwio.shape
    pad = (kw - 1) // 2
    xs = jnp.arange(width)
    xo = jnp.arange(width)
    kx = jnp.arange(kw)
    ind = (xs[None, :, None] == xo[None, None, :] + kx[:, None, None] - pad)
    ind = ind.astype(w_hwio.dtype)                        # (kw, W, W)
    B = jnp.einsum('kpx,ykio->ypixo', ind, w_hwio)        # (kh, W, ci, W, co)
    return B.reshape(kh, width * ci, width * co).astype(dtype)


def _band_conv1x1(w_io, width, dtype=jnp.bfloat16):
    """Block-diagonal matrix for a 1x1 conv in the fused (W*C) lane layout."""
    ci, co = w_io.shape
    eye = jnp.eye(width, dtype=w_io.dtype)
    B = jnp.einsum('px,io->pixo', eye, w_io)              # (W, ci, W, co)
    return B.reshape(width * ci, width * co).astype(dtype)


def basic_block_forward(x_nchw, p, *, stride=1, eps=1e-5):
    """Wrapper: NCHW in/out (PyTorch convention); kernel runs in fused NHWC."""
    # TODO(synk): stride>1 (downsampling blocks) would need strided band
    # matrices and a strided output grid; only stride=1 is implemented here.
    assert stride == 1, "only stride=1 implemented in the Pallas kernel"
    # TODO(synk): for production WideResNet sizes, add an H row-tile grid axis
    # (1-row halo via overlapping index_map) and share one padded scratch.

    N, Cin, H, W = x_nchw.shape
    Cout = p["w1"].shape[0]
    has_shortcut = (Cin != Cout) or (stride != 1)
    if not has_shortcut:
        assert Cin == Cout, "identity shortcut requires in_planes == out_planes"

    f32 = jnp.float32
    # fused (W, C)-on-lanes layout: (N, H, W*C), C minor.
    x = jnp.transpose(x_nchw, (0, 2, 3, 1)).astype(f32).reshape(N, H, W * Cin)

    # conv weights: OIHW -> HWIO -> band matrices (precomputable per model).
    w1 = jnp.transpose(p["w1"], (2, 3, 1, 0)).astype(f32)    # (3,3,Cin,Cout)
    w2 = jnp.transpose(p["w2"], (2, 3, 1, 0)).astype(f32)    # (3,3,Cout,Cout)
    B1 = _band_conv3x3(w1, W)                                # (3, W*Cin,  W*Cout) bf16
    B2 = _band_conv3x3(w2, W)                                # (3, W*Cout, W*Cout) bf16

    s1, b1 = _fold_bn(p["bn1_gamma"], p["bn1_beta"], p["bn1_mean"], p["bn1_var"], eps)
    s2, b2 = _fold_bn(p["bn2_gamma"], p["bn2_beta"], p["bn2_mean"], p["bn2_var"], eps)
    s1 = jnp.tile(s1.astype(f32), W).reshape(1, W * Cin)
    b1 = jnp.tile(b1.astype(f32), W).reshape(1, W * Cin)
    s2 = jnp.tile(s2.astype(f32), W).reshape(1, W * Cout)
    b2 = jnp.tile(b2.astype(f32), W).reshape(1, W * Cout)

    operands = [x, s1, b1, B1, s2, b2, B2]
    in_specs = [
        pl.BlockSpec((1, H, W * Cin), lambda n: (n, 0, 0)),           # x: one image/step
        pl.BlockSpec((1, W * Cin), lambda n: (0, 0)),                 # s1 (resident)
        pl.BlockSpec((1, W * Cin), lambda n: (0, 0)),                 # b1
        pl.BlockSpec((3, W * Cin, W * Cout), lambda n: (0, 0, 0)),    # B1
        pl.BlockSpec((1, W * Cout), lambda n: (0, 0)),                # s2
        pl.BlockSpec((1, W * Cout), lambda n: (0, 0)),                # b2
        pl.BlockSpec((3, W * Cout, W * Cout), lambda n: (0, 0, 0)),   # B2
    ]
    if has_shortcut:
        wsc = jnp.transpose(p["wsc"][:, :, 0, 0], (1, 0)).astype(f32)   # (Cin, Cout)
        operands.append(_band_conv1x1(wsc, W))                          # (W*Cin, W*Cout)
        in_specs.append(pl.BlockSpec((W * Cin, W * Cout), lambda n: (0, 0)))

    kernel = functools.partial(basic_block_kernel, has_shortcut=has_shortcut)

    out_fused = pl.pallas_call(
        kernel,
        grid=(N,),
        in_specs=in_specs,
        out_specs=pl.BlockSpec((1, H, W * Cout), lambda n: (n, 0, 0)),
        out_shape=jax.ShapeDtypeStruct((N, H, W * Cout), f32),
        scratch_shapes=[
            pltpu.VMEM((H + 2, W * Cin), f32),    # row-padded relu(bn1(x))
            pltpu.VMEM((H + 2, W * Cout), f32),   # row-padded relu(bn2(conv1))
        ],
        compiler_params=pltpu.CompilerParams(
            dimension_semantics=("parallel",)),
    )(*operands)

    return jnp.transpose(out_fused.reshape(N, H, W, Cout), (0, 3, 1, 2))  # NCHW


def reference_forward(x, p, *, stride=1, eps=1e-5):
    """Pure-JAX NCHW reference (eval-mode BN) for validation."""
    def bn(v, g, b, m, var):
        g, b, m, var = (a[None, :, None, None] for a in (g, b, m, var))
        return (v - m) / jnp.sqrt(var + eps) * g + b

    dn = ("NCHW", "OIHW", "NCHW")
    h = jax.nn.relu(bn(x, p["bn1_gamma"], p["bn1_beta"], p["bn1_mean"], p["bn1_var"]))
    has_shortcut = (x.shape[1] != p["w1"].shape[0]) or (stride != 1)
    if has_shortcut:
        res = lax.conv_general_dilated(h, p["wsc"], (stride, stride), "VALID",
                                       dimension_numbers=dn)
    else:
        res = x
    o = lax.conv_general_dilated(h, p["w1"], (stride, stride), ((1, 1), (1, 1)),
                                 dimension_numbers=dn)
    o = jax.nn.relu(bn(o, p["bn2_gamma"], p["bn2_beta"], p["bn2_mean"], p["bn2_var"]))
    o = lax.conv_general_dilated(o, p["w2"], (1, 1), ((1, 1), (1, 1)),
                                 dimension_numbers=dn)
    return o + res


if __name__ == "__main__":
    key = jax.random.PRNGKey(0)
    keys = jax.random.split(key, 8)

    # small shapes consistent with the module: in_planes=4, out_planes=8, stride=1
    N, Cin, H, W = 2, 4, 16, 16
    Cout, stride = 8, 1

    x = jax.random.normal(keys[0], (N, Cin, H, W), jnp.float32)

    def kaiming(k, cout, cin, kh, kw):
        # nn.init.kaiming_normal_ default: fan_in, gain=sqrt(2)
        std = jnp.sqrt(2.0 / (cin * kh * kw))
        return jax.random.normal(k, (cout, cin, kh, kw), jnp.float32) * std

    params = dict(
        # BN weights initialized to 1.0 (as in __init__), bias defaults to 0;
        # running stats drawn deterministically (eval-mode BN).
        bn1_gamma=jnp.ones((Cin,), jnp.float32),
        bn1_beta=jnp.zeros((Cin,), jnp.float32),
        bn1_mean=0.1 * jax.random.normal(keys[1], (Cin,), jnp.float32),
        bn1_var=jax.random.uniform(keys[2], (Cin,), jnp.float32, 0.5, 1.5),
        w1=kaiming(keys[3], Cout, Cin, 3, 3),
        bn2_gamma=jnp.ones((Cout,), jnp.float32),
        bn2_beta=jnp.zeros((Cout,), jnp.float32),
        bn2_mean=0.1 * jax.random.normal(keys[4], (Cout,), jnp.float32),
        bn2_var=jax.random.uniform(keys[5], (Cout,), jnp.float32, 0.5, 1.5),
        w2=kaiming(keys[6], Cout, Cout, 3, 3),
        wsc=kaiming(keys[7], Cout, Cin, 1, 1),
    )

    out = basic_block_forward(x, params, stride=stride)
    out = jax.block_until_ready(out)

    ref = reference_forward(x, params, stride=stride)
    assert out.shape == ref.shape == (N, Cout, H, W), (out.shape, ref.shape)

    # bf16 MXU operands (f32 accumulation) vs. a pure-f32 reference:
    # tolerance scaled to the output magnitude (a semantic bug gives O(scale)
    # errors everywhere; bf16 rounding stays well under 5% of scale here).
    max_err = float(jnp.max(jnp.abs(out - ref)))
    ref_scale = max(1.0, float(jnp.max(jnp.abs(ref))))
    if max_err > 5e-2 * ref_scale:
        raise AssertionError(
            f"kernel/reference mismatch, max abs err = {max_err}, scale = {ref_scale}")

    print("KERNEL_OK")
</pallas_src>

<mosaic_0001>
module attributes {stable_mosaic.version = 11 : i64} {
  func.func @basic_block_kernel(%arg0: i32, %arg1: memref<1x16x64xf32, #tpu.memory_space<vmem>>, %arg2: memref<1x64xf32, #tpu.memory_space<vmem>>, %arg3: memref<1x64xf32, #tpu.memory_space<vmem>>, %arg4: memref<3x64x128xbf16, #tpu.memory_space<vmem>>, %arg5: memref<1x128xf32, #tpu.memory_space<vmem>>, %arg6: memref<1x128xf32, #tpu.memory_space<vmem>>, %arg7: memref<3x128x128xbf16, #tpu.memory_space<vmem>>, %arg8: memref<64x128xbf16, #tpu.memory_space<vmem>>, %arg9: memref<1x16x128xf32, #tpu.memory_space<vmem>>, %arg10: memref<18x64xf32, #tpu.memory_space<vmem>>, %arg11: memref<18x128xf32, #tpu.memory_space<vmem>>) attributes {dimension_semantics = [#tpu.dimension_semantics<parallel>], iteration_bounds = array<i64: 2>, scalar_prefetch = 0 : i64, scratch_operands = 2 : i64, tpu.core_type = #tpu.core_type<tc>, window_params = [{transform_indices = @transform_0, window_bounds = array<i64: 1, 16, 64>}, {pipeline_mode = #tpu.pipeline_mode<synchronous>, transform_indices = @transform_1, window_bounds = array<i64: 1, 64>}, {pipeline_mode = #tpu.pipeline_mode<synchronous>, transform_indices = @transform_2, window_bounds = array<i64: 1, 64>}, {pipeline_mode = #tpu.pipeline_mode<synchronous>, transform_indices = @transform_3, window_bounds = array<i64: 3, 64, 128>}, {pipeline_mode = #tpu.pipeline_mode<synchronous>, transform_indices = @transform_4, window_bounds = array<i64: 1, 128>}, {pipeline_mode = #tpu.pipeline_mode<synchronous>, transform_indices = @transform_5, window_bounds = array<i64: 1, 128>}, {pipeline_mode = #tpu.pipeline_mode<synchronous>, transform_indices = @transform_6, window_bounds = array<i64: 3, 128, 128>}, {pipeline_mode = #tpu.pipeline_mode<synchronous>, transform_indices = @transform_7, window_bounds = array<i64: 64, 128>}, {transform_indices = @transform_8, window_bounds = array<i64: 1, 16, 128>}]} {
    %c0 = arith.constant 0 : index
    %c0_0 = arith.constant 0 : index
    %c0_1 = arith.constant 0 : index
    %0 = vector.load %arg1[%c0, %c0_0, %c0_1] : memref<1x16x64xf32, #tpu.memory_space<vmem>>, vector<1x16x64xf32>
    %1 = vector.shape_cast %0 : vector<1x16x64xf32> to vector<16x64xf32>
    %c0_2 = arith.constant 0 : index
    %c0_3 = arith.constant 0 : index
    %2 = vector.load %arg2[%c0_2, %c0_3] : memref<1x64xf32, #tpu.memory_space<vmem>>, vector<1x64xf32>
    %3 = vector.broadcast %2 : vector<1x64xf32> to vector<16x64xf32>
    %4 = arith.mulf %1, %3 : vector<16x64xf32>
    %c0_4 = arith.constant 0 : index
    %c0_5 = arith.constant 0 : index
    %5 = vector.load %arg3[%c0_4, %c0_5] : memref<1x64xf32, #tpu.memory_space<vmem>>, vector<1x64xf32>
    %6 = vector.broadcast %5 : vector<1x64xf32> to vector<16x64xf32>
    %7 = arith.addf %4, %6 : vector<16x64xf32>
    %cst = arith.constant 0.000000e+00 : f32
    %8 = vector.broadcast %cst : f32 to vector<16x64xf32>
    %9 = arith.maximumf %7, %8 : vector<16x64xf32>
    %10 = arith.truncf %9 : vector<16x64xf32> to vector<16x64xbf16>
    %c0_6 = arith.constant 0 : index
    %c0_7 = arith.constant 0 : index
    %11 = vector.load %arg8[%c0_6, %c0_7] : memref<64x128xbf16, #tpu.memory_space<vmem>>, vector<64x128xbf16>
    %cst_8 = arith.constant dense<0.000000e+00> : vector<16x128xf32>
    %12 = tpu.matmul %10, %11, %cst_8 {dimension_numbers = #tpu.dot_dimension_numbers<[1], [0], [0], [1], [0, 0, 1, 1], [], []>} : vector<16x64xbf16>, vector<64x128xbf16>, vector<16x128xf32> -> vector<16x128xf32>
    %cst_9 = arith.constant 0.000000e+00 : f32
    %13 = vector.broadcast %cst_9 : f32 to vector<1x64xf32>
    %c0_10 = arith.constant 0 : index
    %c0_11 = arith.constant 0 : index
    %14 = vector.load %arg10[%c0_10, %c0_11] : memref<18x64xf32, #tpu.memory_space<vmem>>, vector<1x64xf32>
    tpu.vector_store %arg10[%c0_10, %c0_11], %13 {strides = array<i32>} : memref<18x64xf32, #tpu.memory_space<vmem>>, vector<1x64xf32>,
    %cst_12 = arith.constant 0.000000e+00 : f32
    %15 = vector.broadcast %cst_12 : f32 to vector<1x64xf32>
    %c17 = arith.constant 17 : index
    %c0_13 = arith.constant 0 : index
    %16 = vector.load %arg10[%c17, %c0_13] : memref<18x64xf32, #tpu.memory_space<vmem>>, vector<1x64xf32>
    tpu.vector_store %arg10[%c17, %c0_13], %15 {strides = array<i32>} : memref<18x64xf32, #tpu.memory_space<vmem>>, vector<1x64xf32>,
    %c1 = arith.constant 1 : index
    %c0_14 = arith.constant 0 : index
    %17 = vector.load %arg10[%c1, %c0_14] : memref<18x64xf32, #tpu.memory_space<vmem>>, vector<16x64xf32>
    tpu.vector_store %arg10[%c1, %c0_14], %9 {strides = array<i32>} : memref<18x64xf32, #tpu.memory_space<vmem>>, vector<16x64xf32>,
    %cst_15 = arith.constant 0.000000e+00 : f32
    %18 = vector.broadcast %cst_15 : f32 to vector<16x128xf32>
    %c0_16 = arith.constant 0 : index
    %c0_17 = arith.constant 0 : index
    %19 = vector.load %arg10[%c0_16, %c0_17] : memref<18x64xf32, #tpu.memory_space<vmem>>, vector<16x64xf32>
    %20 = arith.truncf %19 : vector<16x64xf32> to vector<16x64xbf16>
    %c0_18 = arith.constant 0 : index
    %c0_19 = arith.constant 0 : index
    %c0_20 = arith.constant 0 : index
    %21 = vector.load %arg4[%c0_18, %c0_19, %c0_20] : memref<3x64x128xbf16, #tpu.memory_space<vmem>>, vector<1x64x128xbf16>
    %22 = vector.shape_cast %21 : vector<1x64x128xbf16> to vector<64x128xbf16>
    %cst_21 = arith.constant dense<0.000000e+00> : vector<16x128xf32>
    %23 = tpu.matmul %20, %22, %cst_21 {dimension_numbers = #tpu.dot_dimension_numbers<[1], [0], [0], [1], [0, 0, 1, 1], [], []>} : vector<16x64xbf16>, vector<64x128xbf16>, vector<16x128xf32> -> vector<16x128xf32>
    %24 = arith.addf %18, %23 : vector<16x128xf32>
    %c1_22 = arith.constant 1 : index
    %c0_23 = arith.constant 0 : index
    %25 = vector.load %arg10[%c1_22, %c0_23] : memref<18x64xf32, #tpu.memory_space<vmem>>, vector<16x64xf32>
    %26 = arith.truncf %25 : vector<16x64xf32> to vector<16x64xbf16>
    %c1_24 = arith.constant 1 : index
    %c0_25 = arith.constant 0 : index
    %c0_26 = arith.constant 0 : index
    %27 = vector.load %arg4[%c1_24, %c0_25, %c0_26] : memref<3x64x128xbf16, #tpu.memory_space<vmem>>, vector<1x64x128xbf16>
    %28 = vector.shape_cast %27 : vector<1x64x128xbf16> to vector<64x128xbf16>
    %cst_27 = arith.constant dense<0.000000e+00> : vector<16x128xf32>
    %29 = tpu.matmul %26, %28, %cst_27 {dimension_numbers = #tpu.dot_dimension_numbers<[1], [0], [0], [1], [0, 0, 1, 1], [], []>} : vector<16x64xbf16>, vector<64x128xbf16>, vector<16x128xf32> -> vector<16x128xf32>
    %30 = arith.addf %24, %29 : vector<16x128xf32>
    %c2 = arith.constant 2 : index
    %c0_28 = arith.constant 0 : index
    %31 = vector.load %arg10[%c2, %c0_28] : memref<18x64xf32, #tpu.memory_space<vmem>>, vector<16x64xf32>
    %32 = arith.truncf %31 : vector<16x64xf32> to vector<16x64xbf16>
    %c2_29 = arith.constant 2 : index
    %c0_30 = arith.constant 0 : index
    %c0_31 = arith.constant 0 : index
    %33 = vector.load %arg4[%c2_29, %c0_30, %c0_31] : memref<3x64x128xbf16, #tpu.memory_space<vmem>>, vector<1x64x128xbf16>
    %34 = vector.shape_cast %33 : vector<1x64x128xbf16> to vector<64x128xbf16>
    %cst_32 = arith.constant dense<0.000000e+00> : vector<16x128xf32>
    %35 = tpu.matmul %32, %34, %cst_32 {dimension_numbers = #tpu.dot_dimension_numbers<[1], [0], [0], [1], [0, 0, 1, 1], [], []>} : vector<16x64xbf16>, vector<64x128xbf16>, vector<16x128xf32> -> vector<16x128xf32>
    %36 = arith.addf %30, %35 : vector<16x128xf32>
    %cst_33 = arith.constant 0.000000e+00 : f32
    %37 = vector.broadcast %cst_33 : f32 to vector<1x128xf32>
    %c0_34 = arith.constant 0 : index
    %c0_35 = arith.constant 0 : index
    %38 = vector.load %arg11[%c0_34, %c0_35] : memref<18x128xf32, #tpu.memory_space<vmem>>, vector<1x128xf32>
    tpu.vector_store %arg11[%c0_34, %c0_35], %37 {strides = array<i32>} : memref<18x128xf32, #tpu.memory_space<vmem>>, vector<1x128xf32>,
    %cst_36 = arith.constant 0.000000e+00 : f32
    %39 = vector.broadcast %cst_36 : f32 to vector<1x128xf32>
    %c17_37 = arith.constant 17 : index
    %c0_38 = arith.constant 0 : index
    %40 = vector.load %arg11[%c17_37, %c0_38] : memref<18x128xf32, #tpu.memory_space<vmem>>, vector<1x128xf32>
    tpu.vector_store %arg11[%c17_37, %c0_38], %39 {strides = array<i32>} : memref<18x128xf32, #tpu.memory_space<vmem>>, vector<1x128xf32>,
    %c0_39 = arith.constant 0 : index
    %c0_40 = arith.constant 0 : index
    %41 = vector.load %arg5[%c0_39, %c0_40] : memref<1x128xf32, #tpu.memory_space<vmem>>, vector<1x128xf32>
    %42 = vector.broadcast %41 : vector<1x128xf32> to vector<16x128xf32>
    %43 = arith.mulf %36, %42 : vector<16x128xf32>
    %c0_41 = arith.constant 0 : index
    %c0_42 = arith.constant 0 : index
    %44 = vector.load %arg6[%c0_41, %c0_42] : memref<1x128xf32, #tpu.memory_space<vmem>>, vector<1x128xf32>
    %45 = vector.broadcast %44 : vector<1x128xf32> to vector<16x128xf32>
    %46 = arith.addf %43, %45 : vector<16x128xf32>
    %cst_43 = arith.constant 0.000000e+00 : f32
    %47 = vector.broadcast %cst_43 : f32 to vector<16x128xf32>
    %48 = arith.maximumf %46, %47 : vector<16x128xf32>
    %c1_44 = arith.constant 1 : index
    %c0_45 = arith.constant 0 : index
    %49 = vector.load %arg11[%c1_44, %c0_45] : memref<18x128xf32, #tpu.memory_space<vmem>>, vector<16x128xf32>
    tpu.vector_store %arg11[%c1_44, %c0_45], %48 {strides = array<i32>} : memref<18x128xf32, #tpu.memory_space<vmem>>, vector<16x128xf32>,
    %c0_46 = arith.constant 0 : index
    %c0_47 = arith.constant 0 : index
    %50 = vector.load %arg11[%c0_46, %c0_47] : memref<18x128xf32, #tpu.memory_space<vmem>>, vector<16x128xf32>
    %51 = arith.truncf %50 : vector<16x128xf32> to vector<16x128xbf16>
    %c0_48 = arith.constant 0 : index
    %c0_49 = arith.constant 0 : index
    %c0_50 = arith.constant 0 : index
    %52 = vector.load %arg7[%c0_48, %c0_49, %c0_50] : memref<3x128x128xbf16, #tpu.memory_space<vmem>>, vector<1x128x128xbf16>
    %53 = vector.shape_cast %52 : vector<1x128x128xbf16> to vector<128x128xbf16>
    %cst_51 = arith.constant dense<0.000000e+00> : vector<16x128xf32>
    %54 = tpu.matmul %51, %53, %cst_51 {dimension_numbers = #tpu.dot_dimension_numbers<[1], [0], [0], [1], [0, 0, 1, 1], [], []>} : vector<16x128xbf16>, vector<128x128xbf16>, vector<16x128xf32> -> vector<16x128xf32>
    %55 = arith.addf %12, %54 : vector<16x128xf32>
    %c1_52 = arith.constant 1 : index
    %c0_53 = arith.constant 0 : index
    %56 = vector.load %arg11[%c1_52, %c0_53] : memref<18x128xf32, #tpu.memory_space<vmem>>, vector<16x128xf32>
    %57 = arith.truncf %56 : vector<16x128xf32> to vector<16x128xbf16>
    %c1_54 = arith.constant 1 : index
    %c0_55 = arith.constant 0 : index
    %c0_56 = arith.constant 0 : index
    %58 = vector.load %arg7[%c1_54, %c0_55, %c0_56] : memref<3x128x128xbf16, #tpu.memory_space<vmem>>, vector<1x128x128xbf16>
    %59 = vector.shape_cast %58 : vector<1x128x128xbf16> to vector<128x128xbf16>
    %cst_57 = arith.constant dense<0.000000e+00> : vector<16x128xf32>
    %60 = tpu.matmul %57, %59, %cst_57 {dimension_numbers = #tpu.dot_dimension_numbers<[1], [0], [0], [1], [0, 0, 1, 1], [], []>} : vector<16x128xbf16>, vector<128x128xbf16>, vector<16x128xf32> -> vector<16x128xf32>
    %61 = arith.addf %55, %60 : vector<16x128xf32>
    %c2_58 = arith.constant 2 : index
    %c0_59 = arith.constant 0 : index
    %62 = vector.load %arg11[%c2_58, %c0_59] : memref<18x128xf32, #tpu.memory_space<vmem>>, vector<16x128xf32>
    %63 = arith.truncf %62 : vector<16x128xf32> to vector<16x128xbf16>
    %c2_60 = arith.constant 2 : index
    %c0_61 = arith.constant 0 : index
    %c0_62 = arith.constant 0 : index
    %64 = vector.load %arg7[%c2_60, %c0_61, %c0_62] : memref<3x128x128xbf16, #tpu.memory_space<vmem>>, vector<1x128x128xbf16>
    %65 = vector.shape_cast %64 : vector<1x128x128xbf16> to vector<128x128xbf16>
    %cst_63 = arith.constant dense<0.000000e+00> : vector<16x128xf32>
    %66 = tpu.matmul %63, %65, %cst_63 {dimension_numbers = #tpu.dot_dimension_numbers<[1], [0], [0], [1], [0, 0, 1, 1], [], []>} : vector<16x128xbf16>, vector<128x128xbf16>, vector<16x128xf32> -> vector<16x128xf32>
    %67 = arith.addf %61, %66 : vector<16x128xf32>
    %c0_64 = arith.constant 0 : index
    %c0_65 = arith.constant 0 : index
    %c0_66 = arith.constant 0 : index
    %68 = vector.load %arg9[%c0_64, %c0_65, %c0_66] : memref<1x16x128xf32, #tpu.memory_space<vmem>>, vector<1x16x128xf32>
    %69 = vector.shape_cast %68 : vector<1x16x128xf32> to vector<16x128xf32>
    %70 = vector.shape_cast %67 : vector<16x128xf32> to vector<1x16x128xf32>
    tpu.vector_store %arg9[%c0_64, %c0_65, %c0_66], %70 {strides = array<i32>} : memref<1x16x128xf32, #tpu.memory_space<vmem>>, vector<1x16x128xf32>,
    return
  }
  func.func @transform_0(%arg0: i32) -> (i32, i32, i32) {
    %c0_i32 = arith.constant 0 : i32
    %c0_i32_0 = arith.constant 0 : i32
    %c0_i32_1 = arith.constant 0 : i32
    return %arg0, %c0_i32, %c0_i32_0 : i32, i32, i32
  }
  func.func @transform_1(%arg0: i32) -> (i32, i32) {
    %c0_i32 = arith.constant 0 : i32
    %c0_i32_0 = arith.constant 0 : i32
    %c0_i32_1 = arith.constant 0 : i32
    return %c0_i32, %c0_i32_0 : i32, i32
  }
  func.func @transform_2(%arg0: i32) -> (i32, i32) {
    %c0_i32 = arith.constant 0 : i32
    %c0_i32_0 = arith.constant 0 : i32
    %c0_i32_1 = arith.constant 0 : i32
    return %c0_i32, %c0_i32_0 : i32, i32
  }
  func.func @transform_3(%arg0: i32) -> (i32, i32, i32) {
    %c0_i32 = arith.constant 0 : i32
    %c0_i32_0 = arith.constant 0 : i32
    %c0_i32_1 = arith.constant 0 : i32
    %c0_i32_2 = arith.constant 0 : i32
    return %c0_i32, %c0_i32_0, %c0_i32_1 : i32, i32, i32
  }
  func.func @transform_4(%arg0: i32) -> (i32, i32) {
    %c0_i32 = arith.constant 0 : i32
    %c0_i32_0 = arith.constant 0 : i32
    %c0_i32_1 = arith.constant 0 : i32
    return %c0_i32, %c0_i32_0 : i32, i32
  }
  func.func @transform_5(%arg0: i32) -> (i32, i32) {
    %c0_i32 = arith.constant 0 : i32
    %c0_i32_0 = arith.constant 0 : i32
    %c0_i32_1 = arith.constant 0 : i32
    return %c0_i32, %c0_i32_0 : i32, i32
  }
  func.func @transform_6(%arg0: i32) -> (i32, i32, i32) {
    %c0_i32 = arith.constant 0 : i32
    %c0_i32_0 = arith.constant 0 : i32
    %c0_i32_1 = arith.constant 0 : i32
    %c0_i32_2 = arith.constant 0 : i32
    return %c0_i32, %c0_i32_0, %c0_i32_1 : i32, i32, i32
  }
  func.func @transform_7(%arg0: i32) -> (i32, i32) {
    %c0_i32 = arith.constant 0 : i32
    %c0_i32_0 = arith.constant 0 : i32
    %c0_i32_1 = arith.constant 0 : i32
    return %c0_i32, %c0_i32_0 : i32, i32
  }
  func.func @transform_8(%arg0: i32) -> (i32, i32, i32) {
    %c0_i32 = arith.constant 0 : i32
    %c0_i32_0 = arith.constant 0 : i32
    %c0_i32_1 = arith.constant 0 : i32
    return %arg0, %c0_i32, %c0_i32_0 : i32, i32, i32
  }
}

</mosaic_0001>

<bundles_post_ra>
// kernel: tpu_custom_call.1
= control target key start
LH: loop header
LB: loop body
LE: loop exit
PB: predicated region body
PF: predicated region fallthrough
CT: control target
= control target key end

     0   :  { %13 = vsyncpa [#allocation5], 0  ;;  %s2151_s0 = inlined_call_operand.hbm [shape: f32[2,16,64], index: 0, kind: input, shape index: {}]   ;;  %s2152_s1 = inlined_call_operand.vmem [shape: f32[1,64], index: 1, kind: input, shape index: {}]   ;;  %s2153_s2 = inlined_call_operand.vmem [shape: f32[1,64], index: 2, kind: input, shape index: {}]   ;;  %s2154_s3 = inlined_call_operand.hbm [shape: bf16[3,64,128], index: 3, kind: input, shape index: {}]   ;;  %s2155_s4 = inlined_call_operand.vmem [shape: f32[1,128], index: 4, kind: input, shape index: {}]   ;;  %s2156_s5 = inlined_call_operand.vmem [shape: f32[1,128], index: 5, kind: input, shape index: {}]   ;;  %s2157_s6 = inlined_call_operand.hbm [shape: bf16[3,128,128], index: 6, kind: input, shape index: {}]   ;;  %s2158_s7 = inlined_call_operand.hbm [shape: bf16[64,128], index: 7, kind: input, shape index: {}]   ;;  %s2159_s8 = inlined_call_operand.hbm [shape: f32[2,16,128], index: 8, kind: output, shape index: {}]  }
   0x1   :  { %15 = vsyncpa [#allocation5 + $0x1], 0 }
   0x2   :  { %16 = vsyncpa [#allocation8], 0 }
   0x3   :  { %17 = vsyncpa [#allocation11], 0 }
   0x4   :  { %18 = vsyncpa [#allocation6], 0 }
   0x5   :  { %20 = vsyncpa [#allocation6 + $0x1], 0  ;;  %s1803_s27 = smov 0   ;;  %s1805_s28 = smov 0  }
   0x6   :  { %s1807_s29 = smov 0   ;;  %s1809_s30 = smov 0  }
   0x7 LB: > { %2165 = sst [smem:[#allocation17_spill]] %s1731_s27  ;;  %s1824_s9 = sadd.s32 4294967295, %s1743_s30   ;;  %s1743_s30 = sphi %s1809_s30, %s2188_s30   ;;  %s1739_s29 = sphi %s1807_s29, %s2187_s29   ;;  %s1735_s28 = sphi %s1805_s28, %s2186_s28   ;;  %s1731_s27 = sphi %s1803_s27, %s2185_s27  }
   0x8   : > { %s1187_s10 = sadd.s32 4294967294, %s1743_s30   ;;  %p46_p0 = scmp.ne.s32.totalorder %s1735_s28, %s1731_s27 }
   0x9   : > { %p2160_p1 = scmp.eq.s32.totalorder %s1824_s9, 0  ;;  %p223_p3 = scmp.eq.s32.totalorder %s1187_s10, 1 }
   0xa   : > { %p1188_p5 = scmp.ge.s32.totalorder %s1743_s30, 1  ;;  %p230_p7 = scmp.lt.s32.totalorder %s1743_s30, 3 }
   0xb   : > { %p1833_p4 = por %p2160_p1, %p46_p0  ;;  %p1838_p6 = por %p223_p3, %p46_p0 }
   0xc   : > { %p1843_p8 = pnand %p1188_p5, %p230_p7  ;;  %s1745_s14 = smov [#allocation7]  }
   0xd   : > { %s2166_s11 = scalar_select %p1833_p4, 1, 0 }
   0xe   : > { %s2167_s12 = scalar_select %p1838_p6, 1, 0 }
   0xf   : > { %s2169_s13 = scalar_select %p1843_p8, 1, 0 }
  0x10   : > { %2168 = sst [smem:[#allocation18_spill]] %s2167_s12  ;;  %s248_s15 = sshll.u32 %s1745_s14, 4  ;;  %s1847_s15 = int_to_ptr.vmem [resolvable:$true] %s248_s15 }
  0x11   : > { %p1446_p9 = pneg %p1843_p8  ;;  %s1746_s17 = smov [#allocation9]  }
  0x12   : > { %s267_s18 = sshll.u32 %s1746_s17, 4  ;;  %s1747_s19 = smov [#allocation10]   ;;  %s1858_s18 = int_to_ptr.vmem [resolvable:$true] %s267_s18 }
  0x13   : > { %p1854_p11 = pnand %p1446_p9, %p2160_p1  ;;  %s1860_s20 = sshll.u32 %s1747_s19, 4  ;;  %s281_s20 = int_to_ptr.vmem [resolvable:$true] %s1860_s20 }
  0x14   : > { %s1555_s23 = scalar_lea.hbm %s2154_s3, 1536 }
  0x15   : > { %p1556_p12 = scmp.ne.s32.totalorder %s2154_s3, %s1555_s23  ;;  %p1870_p13 = pneg %p1854_p11 }
  0x16   : > { %p1562_p5 = scmp.lt.u32.totalorder %s1555_s23, %s2154_s3 }
  0x17   : > { %p1558_p0 = pnand %p1870_p13, %p1556_p12 }
  0x19   : > { %p1559_p3 = pneg %p1558_p0 }
  0x1b   : > { %p1564_p7 = pnand %p1562_p5, %p1559_p3 }
  0x1d   : > { %1567 = shalt.err (!%p1564_p7)
}
  0x1e   : > { %s1568_s17 = scalar_lea.vmem %s1847_s15, 1536  ;;  %p1576_p2 = scmp.lt.s32.totalorder %s1847_s15, %s1847_s15 }
  0x1f   : > { %p1569_p9 = scmp.ne.s32.totalorder %s1847_s15, %s1568_s17  ;;  %p1577_p6 = scmp.lt.s32.totalorder %s1568_s17, %s1568_s17 }
  0x21   : > { %p1571_p10 = pnand %p1569_p9, %p1870_p13  ;;  %p1578_p12 = por %p1577_p6, %p1576_p2 }
  0x23   : > { %p1572_p1 = pneg %p1571_p10 }
  0x25   : > { %p1579_p0 = pnand %p1578_p12, %p1572_p1 }
  0x27   : > { %1582 = shalt.err (!%p1579_p0)
}
  0x28   : > { %s1748_s19 = smov 64   ;;  %s1749_s21 = smov 4  }
  0x29   : > { %1449 = dma.hbm_to_vmem [thread:$0]  (!%p1854_p11), %s2154_s3, 1536, %s1847_s15, [#allocation8], %s1748_s19, %s1748_s19, %s1749_s21  }
  0x2a   : > { %s1583_s10 = scalar_lea.hbm %s2157_s6, 3072 }
  0x2b   : > { %p1584_p1 = scmp.ne.s32.totalorder %s2157_s6, %s1583_s10  ;;  %p1590_p10 = scmp.lt.u32.totalorder %s1583_s10, %s2157_s6 }
  0x2d   : > { %p1586_p2 = pnand %p1584_p1, %p1870_p13 }
  0x2f   : > { %p1587_p6 = pneg %p1586_p2 }
  0x31   : > { %p1592_p3 = pnand %p1590_p10, %p1587_p6 }
  0x33   : > { %1595 = shalt.err (!%p1592_p3)
}
  0x34   : > { %s1596_s15 = scalar_lea.vmem %s1858_s18, 3072  ;;  %p1604_p12 = scmp.lt.s32.totalorder %s1858_s18, %s1858_s18 }
  0x35   : > { %p1597_p5 = scmp.ne.s32.totalorder %s1858_s18, %s1596_s15  ;;  %p1605_p0 = scmp.lt.s32.totalorder %s1596_s15, %s1596_s15 }
  0x37   : > { %p1599_p7 = pnand %p1597_p5, %p1870_p13  ;;  %p1606_p1 = por %p1605_p0, %p1604_p12 }
  0x39   : > { %p1600_p9 = pneg %p1599_p7 }
  0x3b   : > { %p1607_p2 = pnand %p1606_p1, %p1600_p9 }
  0x3d   : > { %1610 = shalt.err (!%p1607_p2)
}
  0x3e   : > { %1452 = dma.hbm_to_vmem [thread:$0]  (!%p1854_p11), %s2157_s6, 3072, %s1858_s18, [#allocation8], %s1748_s19, %s1748_s19, %s1749_s21  }
  0x3f   : > { %s1611_s24 = scalar_lea.hbm %s2158_s7, 512 }
  0x40   : > { %p1612_p6 = scmp.ne.s32.totalorder %s2158_s7, %s1611_s24  ;;  %p1618_p5 = scmp.lt.u32.totalorder %s1611_s24, %s2158_s7 }
  0x42   : > { %p1614_p10 = pnand %p1612_p6, %p1870_p13 }
  0x44   : > { %p1615_p3 = pneg %p1614_p10 }
  0x46   : > { %p1620_p7 = pnand %p1618_p5, %p1615_p3 }
  0x48   : > { %1623 = shalt.err (!%p1620_p7)
}
  0x49   : > { %s1624_s15 = scalar_lea.vmem %s281_s20, 512  ;;  %p1632_p1 = scmp.lt.s32.totalorder %s281_s20, %s281_s20 }
  0x4a   : > { %p1625_p9 = scmp.ne.s32.totalorder %s281_s20, %s1624_s15  ;;  %p1633_p2 = scmp.lt.s32.totalorder %s1624_s15, %s1624_s15 }
  0x4c   : > { %p1627_p12 = pnand %p1625_p9, %p1870_p13  ;;  %p1634_p4 = por %p1633_p2, %p1632_p1 }
  0x4e   : > { %p1628_p0 = pneg %p1627_p12 }
  0x50   : > { %p1635_p8 = pnand %p1634_p4, %p1628_p0 }
  0x52   : > { %1638 = shalt.err (!%p1635_p8)
}
  0x53   : > { %1455 = dma.hbm_to_vmem [thread:$0]  (!%p1854_p11), %s2158_s7, 512, %s281_s20, [#allocation11], %s1748_s19, %s1748_s19, %s1749_s21  }
  0x54   : > { %s1943_s26 = sadd.s32 1, %s1743_s30   ;;  %s33_s12 = sadd.s32 1, %s1739_s29 }
  0x55   : > { %s30_s16 = ssub.s32 %s1743_s30, %s1943_s26  ;;  %p40_p8 = scmp.ne.s32.totalorder %s1739_s29, %s1735_s28 }
  0x56   : > { %p31_p4 = scmp.eq.s32.totalorder %s30_s16, 0  ;;  %p41_p13 = scmp.eq.s32.totalorder %s1743_s30, 0 }
  0x57   : > { %p1467_p6 = scmp.lt.s32.totalorder %s1743_s30, 2  ;;  %p2172_p3 = scmp.eq.s32.totalorder %s1824_s9, 1 }
  0x58   : > { %s1953_s22 = scalar_select %p31_p4, %s1739_s29, %s33_s12  }
  0x59   : > { %p42_p10 = por %p41_p13, %p40_p8  ;;  %p1957_p5 = por %p2172_p3, %p40_p8 }
  0x5a   : > { %s294_s24 = sand.u32 1, %s1739_s29   ;;  %s1255_s25 = sshll.u32 %s1743_s30, 8 }
  0x5b   : > { %s1193_s20 = sshll.u32 %s294_s24, 4  ;;  %s1966_s10 = scalar_lea.hbm %s2151_s0, %s1255_s25 }
  0x5c   : > { %s298_s14 = scalar_lea.vmem [#allocation4], %s1193_s20  ;;  %p1968_p11 = pnand %p1467_p6, %p42_p10 }
  0x5d   : > { %s305_s17 = sshll.u32 %s298_s14, 4  ;;  %s1974_s18 = scalar_lea.sflag [#allocation5], %s294_s24  ;;  %s1972_s17 = int_to_ptr.vmem [resolvable:$true] %s305_s17 }
  0x5e   : > { %s1639_s27 = scalar_lea.hbm %s1966_s10, 256  ;;  %p1641_p9 = pneg %p1968_p11 }
  0x5f   : > { %p1640_p7 = scmp.ne.s32.totalorder %s1966_s10, %s1639_s27  ;;  %s1644_s25 = scalar_lea.hbm %s2151_s0, 512 }
  0x60   : > { %p1645_p1 = scmp.lt.u32.totalorder %s1966_s10, %s2151_s0  ;;  %p1646_p2 = scmp.lt.u32.totalorder %s1644_s25, %s1639_s27 }
  0x61   : > { %p1642_p12 = pnand %p1641_p9, %p1640_p7  ;;  %p1648_p8 = scmp.lt.u32.totalorder %s1639_s27, %s1966_s10 }
  0x62   : > { %p1647_p4 = por %p1646_p2, %p1645_p1 }
  0x63   : > { %p1643_p0 = pneg %p1642_p12 }
  0x64   : > { %p1649_p13 = por %p1648_p8, %p1647_p4 }
  0x66   : > { %p1650_p6 = pnand %p1649_p13, %p1643_p0 }
  0x68   : > { %1653 = shalt.err (!%p1650_p6)
}
  0x69   : > { %s1654_s24 = scalar_lea.vmem %s1972_s17, 256  ;;  %s1750_s21 = smov [#allocation4]  }
  0x6a   : > { %p1655_p10 = scmp.ne.s32.totalorder %s1972_s17, %s1654_s24  ;;  %s1659_s14 = sshll.u32 %s1750_s21, 4  ;;  %s1660_s14 = int_to_ptr.vmem [resolvable:$false] %s1659_s14 }
  0x6b   : > { %s1661_s16 = scalar_lea.vmem %s1660_s14, 512  ;;  %p1662_p12 = scmp.lt.s32.totalorder %s1972_s17, %s1660_s14 }
  0x6c   : > { %p1657_p3 = pnand %p1655_p10, %p1641_p9  ;;  %p1663_p1 = scmp.lt.s32.totalorder %s1661_s16, %s1654_s24 }
  0x6e   : > { %p1658_p7 = pneg %p1657_p3  ;;  %p1664_p2 = por %p1663_p1, %p1662_p12 }
  0x70   : > { %p1665_p4 = pnand %p1664_p2, %p1658_p7 }
  0x72   : > { %1668 = shalt.err (!%p1665_p4)
}
  0x73   : > { %s1751_s27 = smov 128   ;;  %s1752_s12 = smov 8  }
  0x74   : > { %1459 = dma.hbm_to_vmem [thread:$0]  (!%p1968_p11), %s1966_s10, 256, %s1972_s17, %s1974_s18, %s1751_s27, %s1751_s27, %s1752_s12  }
  0x75   : > { %p2175_p9 = scmp.ne.s32.totalorder %s2169_s13, 0 }
  0x76   : > { %s2005_s25 = sand.u32 (!%p2175_p9), 1, %s1735_s28   ;;  %p2176_p0 = scmp.ne.s32.totalorder (!%p2175_p9), %s2166_s11, 0 }
  0x77   : > { %317 = sbr.rel (%p2175_p9) target bundleno = 671 (0x29f), region = 52  ;;  %s1197_s20 = sshll.u32 (!%p2175_p9), %s2005_s25, 4 }
  0x78   : > { %s320_s19 = scalar_lea.sflag (!%p2175_p9), [#allocation5], %s2005_s25  ;;  %s323_s24 = scalar_lea.vmem (!%p2175_p9), [#allocation4], %s1197_s20 }
  0x7e   : > { %1714 = dma.done.wait (%p2176_p0), %s320_s19, 256  }
  0x7f   : > { %1716 = vsyncadd (%p2176_p0), %s320_s19, 4294967040  ;;  %p2177_p11 = scmp.eq.s32.totalorder %s1824_s9, 0 }
  0x81   : > { %1718 = dma.done.wait (%p2177_p11), [#allocation8], 4608   ;;  %p2178_p8 = pmov %p2177_p11 }
  0x83   : > { %1720 = vsyncadd (%p2178_p8), [#allocation8], 4294962688  ;;  %p2179_p13 = pmov %p2178_p8 }
  0x84   : > { %p2180_p6 = pmov %p2178_p8 }
  0x85   : > { %1722 = dma.done.wait (%p2179_p13), [#allocation11], 512  }
  0x86   : > { %1724 = vsyncadd (%p2180_p6), [#allocation11], 4294966784  ;;  %vm400_vm0 = vcmask 516096   ;;  %v1753_v0 = vmov 0.0   ;;  %vm1754_vm1 = vmmov 0   ;;  %v1515_v1 = vld [vmem:[#allocation7 + $0x20] sm:$0xff]  }
  0x87   : > { %1304 = vmatprep.subr.bf16.mxu0 %v1753_v0  ;;  %647 = vst [vmem:[#allocation3] sm:$0x1] %v1753_v0  ;;  %648 = vst [vmem:[#allocation3 + $0x11] sm:$0x1] %v1753_v0  ;;  %1312 = vmatprep.mubr.msk.bf16.mxu0 %vm1754_vm1, %v1753_v0  ;;  %v1516_v2 = vld [vmem:[#allocation7 + $0x28] sm:$0xff]   ;;  %v369_v3 = vld [vmem:[%s323_s24] sm:$0xff] }
  0x88   : > { %401 = vst.msk [vmem:[#allocation2] sm:$0x1] %vm400_vm0, %v1753_v0  ;;  %402 = vst.msk [vmem:[#allocation2 + $0x11] sm:$0x1] %vm400_vm0, %v1753_v0  ;;  %1360 = vmatprep.subr.bf16.mxu1 %v1753_v0  ;;  %1368 = vmatprep.mubr.msk.bf16.mxu1 %vm1754_vm1, %v1753_v0  ;;  %v370_v4 = vld [vmem:[%s323_s24 + $0x8] sm:$0xff]  ;;  %v1517_v9 = vld [vmem:[#allocation7 + $0x30] sm:$0xff]  }
  0x89   : > { %1305 = vmatpush3.bf16.msra.mxu0 %v1515_v1  ;;  %v1202_v5 = vld [vmem:[%s2152_s1] ss:$0 sm:$0xff]  ;;  %vm403_vm2 = vcmask 523264   ;;  %v1518_v12 = vld [vmem:[#allocation7 + $0x38] sm:$0xff]   ;;  %v1527_v15 = vld [vmem:[#allocation10] sm:$0xff]   ;;  %s367_s16 = scalar_lea.vmem [#allocation12], %s1197_s20 }
  0x8a   : > { %1306 = vmatprep.subr.bf16.mxu0 %v1753_v0  ;;  %v378_v6 = vmul.f32 %v1202_v5, %v369_v3  ;;  %v379_v7 = vmul.f32 %v1202_v5, %v370_v4  ;;  %v1203_v8 = vld [vmem:[%s2153_s2] ss:$0 sm:$0xff]  ;;  %1361 = vmatpush3.bf16.msra.mxu1 %v1527_v15  ;;  %v1528_v16 = vld [vmem:[#allocation10 + $0x8] sm:$0xff]   ;;  %v1519_v19 = vld [vmem:[#allocation7] sm:$0xff]   ;;  %s1085_s27 = sshll.u32 %s367_s16, 4  ;;  %s1256_s12 = sshll.u32 %s1824_s9, 8  ;;  %s2102_s27 = int_to_ptr.vmem [resolvable:$true] %s1085_s27 }
  0x8b   : > { %1362 = vmatprep.subr.bf16.mxu1 %v1753_v0  ;;  %v1529_v21 = vld [vmem:[#allocation10 + $0x10] sm:$0xff]   ;;  %v1520_v22 = vld [vmem:[#allocation7 + $0x8] sm:$0xff]   ;;  %v1530_v23 = vld [vmem:[#allocation10 + $0x18] sm:$0xff]   ;;  %s2107_s11 = scalar_lea.hbm %s2159_s8, %s1256_s12  ;;  %s1072_s20 = scalar_lea.sflag [#allocation6], %s2005_s25 }
  0x8c   : > { %v387_v10 = vadd.f32 %v1203_v8, %v378_v6  ;;  %v388_v11 = vadd.f32 %v1203_v8, %v379_v7  ;;  %v1521_v24 = vld [vmem:[#allocation7 + $0x10] sm:$0xff]   ;;  %v1531_v25 = vld [vmem:[#allocation9 + $0x40] sm:$0xff]   ;;  %v1522_v27 = vld [vmem:[#allocation7 + $0x18] sm:$0xff]   ;;  %s1669_s9 = scalar_lea.vmem %s2102_s27, 256  ;;  %s1755_s13 = smov [#allocation12]  }
  0x8d   : > { %1307 = vmatpush3.bf16.msra.mxu0 %v1516_v2  ;;  %v1533_v30 = vld [vmem:[#allocation9 + $0x48] sm:$0xff]   ;;  %v1523_v31 = vld [vmem:[#allocation7 + $0x40] sm:$0xff]   ;;  %v1535_v33 = vld [vmem:[#allocation9 + $0x50] sm:$0xff]   ;;  %p1670_p10 = scmp.ne.s32.totalorder %s2102_s27, %s1669_s9  ;;  %s1673_s10 = sshll.u32 %s1755_s13, 4  ;;  %s1674_s10 = int_to_ptr.vmem [resolvable:$false] %s1673_s10 }
  0x8e   : > { %1308 = vmatprep.subr.bf16.mxu0 %v1753_v0  ;;  %v389_v13 = vmax.f32 %v387_v10, 0.0  ;;  %v390_v14 = vmax.f32 %v388_v11, 0.0  ;;  %1363 = vmatpush3.bf16.msra.mxu1 %v1528_v16  ;;  %v1524_v34 = vld [vmem:[#allocation7 + $0x48] sm:$0xff]   ;;  %v1537_v35 = vld [vmem:[#allocation9 + $0x58] sm:$0xff]   ;;  %v1525_v36 = vld [vmem:[#allocation7 + $0x50] sm:$0xff]   ;;  %s1675_s17 = scalar_lea.vmem %s1674_s10, 512  ;;  %p1676_p12 = scmp.lt.s32.totalorder %s2102_s27, %s1674_s10 }
  0x8f   : > { %1364 = vmatprep.subr.bf16.mxu1 %v1753_v0  ;;  %v1526_v37 = vld [vmem:[#allocation7 + $0x58] sm:$0xff]   ;;  %v1532_v41 = vld [vmem:[#allocation9] sm:$0xff]   ;;  %v1534_v42 = vld [vmem:[#allocation9 + $0x8] sm:$0xff]   ;;  %p1671_p3 = pnand %p1670_p10, %p1957_p5  ;;  %p1677_p1 = scmp.lt.s32.totalorder %s1675_s17, %s1669_s9 }
  0x90   : > { %404 = vst.msk [vmem:[#allocation2 + $0x1] sm:$0xff] %vm403_vm2, %v389_v13  ;;  %405 = vst.msk [vmem:[#allocation2 + $0x9] sm:$0xff] %vm403_vm2, %v390_v14  ;;  %v391_v26 = vpack.c.bf16 %v390_v14, %v389_v13  ;;  %v1536_v43 = vld [vmem:[#allocation9 + $0x10] sm:$0xff]   ;;  %v1539_v44 = vld [vmem:[#allocation9 + $0x60] sm:$0xff]  }
  0x91   : > { %1309 = vmatpush3.bf16.msra.mxu0 %v1517_v9  ;;  %v1541_v45 = vld [vmem:[#allocation9 + $0x68] sm:$0xff]   ;;  %v1538_v46 = vld [vmem:[#allocation9 + $0x18] sm:$0xff]   ;;  %v1543_v47 = vld [vmem:[#allocation9 + $0x70] sm:$0xff]   ;;  %p1672_p7 = pneg %p1671_p3  ;;  %p1678_p2 = por %p1677_p1, %p1676_p12 }
  0x92   : > { %1310 = vmatprep.subr.bf16.mxu0 %v1753_v0  ;;  %1365 = vmatpush3.bf16.msra.mxu1 %v1529_v21  ;;  %v1540_v48 = vld [vmem:[#allocation9 + $0x20] sm:$0xff]   ;;  %v1545_v49 = vld [vmem:[#allocation9 + $0x78] sm:$0xff]   ;;  %v1542_v50 = vld [vmem:[#allocation9 + $0x28] sm:$0xff]  }
  0x93   : > { %1366 = vmatprep.subr.bf16.mxu1 %v1753_v0  ;;  %v1544_v51 = vld [vmem:[#allocation9 + $0x30] sm:$0xff]   ;;  %v1546_v52 = vld [vmem:[#allocation9 + $0x38] sm:$0xff]   ;;  %v1547_v2 = vld [vmem:[#allocation9 + $0x80] sm:$0xff]   ;;  %p1679_p4 = pnand %p1678_p2, %p1672_p7 }
  0x94   : > { %v1219_v53 = vld [vmem:[%s2155_s4] ss:$0 sm:$0xff]  ;;  %v1548_v4 = vld [vmem:[#allocation9 + $0x88] sm:$0xff]   ;;  %v1550_v9 = vld [vmem:[#allocation9 + $0x98] sm:$0xff]  }
  0x95   : > { %1311 = vmatpush3.bf16.msra.mxu0 %v1518_v12  ;;  %v1220_v55 = vld [vmem:[%s2156_s5] ss:$0 sm:$0xff]  ;;  %v1551_v10 = vld [vmem:[#allocation9 + $0xa0] sm:$0xff]   ;;  %v1552_v11 = vld [vmem:[#allocation9 + $0xa8] sm:$0xff]  }
  0x96   : > { %1316 = vmatprep.subr.bf16.mxu0 %v1753_v0  ;;  %1367 = vmatpush3.bf16.msra.mxu1 %v1530_v23  ;;  %v1549_v7 = vld [vmem:[#allocation9 + $0x90] sm:$0xff]   ;;  %v1554_v13 = vld [vmem:[#allocation9 + $0xb8] sm:$0xff]  }
  0x97   : > { %v417_v17 = vld [vmem:[#allocation2 + $0x1] sm:$0xff]  ;;  %v418_v18 = vld [vmem:[#allocation2 + $0x9] sm:$0xff]  ;;  %1372 = vmatprep.subr.bf16.mxu1 %v1753_v0 }
  0x98   : > { %v419_v20 = vpack.c.bf16 %v418_v18, %v417_v17  ;;  %v406_v28 = vld [vmem:[#allocation2] sm:$0xff]  ;;  %v407_v29 = vld [vmem:[#allocation2 + $0x8] sm:$0xff] }
  0x99   : > { %1369 = vmatmul.mubr.msk.bf16.vlgmr.msra.gmra.mrb[0].mxu1 %vm403_vm2, %v391_v26  ;;  %v408_v32 = vpack.c.bf16 %v407_v29, %v406_v28  ;;  %v565_v38 = vld [vmem:[#allocation2 + $0x2] sm:$0xff]  ;;  %v566_v39 = vld [vmem:[#allocation2 + $0xa] sm:$0xff] }
  0x9a   : > { %1313 = vmatmul.mubr.msk.bf16.vlgmr.msra.gmra.mrb[0].mxu0 %vm403_vm2, %v419_v20  ;;  %1373 = vmatpush3.bf16.msra.mxu1 %v1531_v25  ;;  %v567_v40 = vpack.c.bf16 %v566_v39, %v565_v38  ;;  %v1553_v12 = vld [vmem:[#allocation9 + $0xb0] sm:$0xff]  }
  0x9b   : > { %1317 = vmatpush3.bf16.msra.mxu0 %v1519_v19  ;;  %1324 = vmatprep.mubr.msk.bf16.mxu0 %vm1754_vm1, %v1753_v0 }
  0x9c   : > { %1318 = vmatprep.subr.bf16.mxu0 %v1753_v0  ;;  %1388 = vmatprep.mubr.msk.bf16.mxu1 %vm1754_vm1, %v1753_v0 }
  0x9d   : > { %1374 = vmatprep.subr.bf16.mxu1 %v1753_v0 }
  0x9e   : > { %1375 = vmatpush3.bf16.msra.mxu1 %v1533_v30 }
  0x9f   : > { %1319 = vmatpush3.bf16.msra.mxu0 %v1520_v22  ;;  %1376 = vmatprep.subr.bf16.mxu1 %v1753_v0 }
  0xa0   : > { %1320 = vmatprep.subr.bf16.mxu0 %v1753_v0 }
  0xa2   : > { %1377 = vmatpush3.bf16.msra.mxu1 %v1535_v33 }
  0xa3   : > { %1321 = vmatpush3.bf16.msra.mxu0 %v1521_v24  ;;  %1378 = vmatprep.subr.bf16.mxu1 %v1753_v0 }
  0xa4   : > { %1322 = vmatprep.subr.bf16.mxu0 %v1753_v0 }
  0xa6   : > { %1379 = vmatpush3.bf16.msra.mxu1 %v1537_v35 }
  0xa7   : > { %1323 = vmatpush3.bf16.msra.mxu0 %v1522_v27  ;;  %1380 = vmatprep.subr.bf16.mxu1 %v1753_v0 }
  0xa8   : > { %1328 = vmatprep.subr.bf16.mxu0 %v1753_v0 }
  0xaa   : > { %1325 = vmatmul.mubr.msk.bf16.vlgmr.msra.gmra.mrb[0].mxu0 %vm403_vm2, %v408_v32  ;;  %1381 = vmatpush3.bf16.msra.mxu1 %v1539_v44 }
  0xab   : > { %1329 = vmatpush3.bf16.msra.mxu0 %v1523_v31  ;;  %1336 = vmatprep.mubr.msk.bf16.mxu0 %vm1754_vm1, %v1753_v0 }
  0xac   : > { %1330 = vmatprep.subr.bf16.mxu0 %v1753_v0  ;;  %1382 = vmatprep.subr.bf16.mxu1 %v1753_v0 }
  0xae   : > { %1383 = vmatpush3.bf16.msra.mxu1 %v1541_v45 }
  0xaf   : > { %1331 = vmatpush3.bf16.msra.mxu0 %v1524_v34  ;;  %1384 = vmatprep.subr.bf16.mxu1 %v1753_v0 }
  0xb0   : > { %1332 = vmatprep.subr.bf16.mxu0 %v1753_v0 }
  0xb2   : > { %1385 = vmatpush3.bf16.msra.mxu1 %v1543_v47 }
  0xb3   : > { %1333 = vmatpush3.bf16.msra.mxu0 %v1525_v36  ;;  %1386 = vmatprep.subr.bf16.mxu1 %v1753_v0 }
  0xb4   : > { %1334 = vmatprep.subr.bf16.mxu0 %v1753_v0 }
  0xb6   : > { %1387 = vmatpush3.bf16.msra.mxu1 %v1545_v49 }
  0xb7   : > { %1335 = vmatpush3.bf16.msra.mxu0 %v1526_v37  ;;  %1392 = vmatprep.subr.bf16.mxu1 %v1753_v0 }
  0xb8   : > { %1340 = vmatprep.subr.bf16.mxu0 %v1753_v0 }
  0xba   : > { %1337 = vmatmul.mubr.msk.bf16.vlgmr.msra.gmra.mrb[0].mxu0 %vm403_vm2, %v567_v40 }
  0xbb   : > { %1341 = vmatpush3.bf16.msra.mxu0 %v1532_v41  ;;  %1356 = vmatprep.mubr.msk.bf16.mxu0 %vm1754_vm1, %v1753_v0 }
  0xbc   : > { %1342 = vmatprep.subr.bf16.mxu0 %v1753_v0 }
  0xbf   : > { %1343 = vmatpush3.bf16.msra.mxu0 %v1534_v42 }
  0xc0   : > { %1344 = vmatprep.subr.bf16.mxu0 %v1753_v0 }
  0xc3   : > { %1345 = vmatpush3.bf16.msra.mxu0 %v1536_v43 }
  0xc4   : > { %1346 = vmatprep.subr.bf16.mxu0 %v1753_v0 }
  0xc7   : > { %1347 = vmatpush3.bf16.msra.mxu0 %v1538_v46 }
  0xc8   : > { %1348 = vmatprep.subr.bf16.mxu0 %v1753_v0 }
  0xcb   : > { %1349 = vmatpush3.bf16.msra.mxu0 %v1540_v48 }
  0xcc   : > { %1350 = vmatprep.subr.bf16.mxu0 %v1753_v0 }
  0xcf   : > { %1351 = vmatpush3.bf16.msra.mxu0 %v1542_v50 }
  0xd0   : > { %1352 = vmatprep.subr.bf16.mxu0 %v1753_v0 }
  0xd3   : > { %1353 = vmatpush3.bf16.msra.mxu0 %v1544_v51 }
  0xd4   : > { %1354 = vmatprep.subr.bf16.mxu0 %v1753_v0 }
  0xd7   : > { %1355 = vmatpush3.bf16.msra.mxu0 %v1546_v52 }
 0x18d   : > { %v638_v54 = vpop.f32.mrb[0].mxu0 }
 0x18e   : > { %v656_v56 = vmul.f32 %v1219_v53, %v638_v54  ;;  %v1338_v57 = vpop.f32.mrb[1].mxu0 }
 0x18f   : > { %v641_v58 = vpop.f32.mrb[2].mxu0 }
 0x190   : > { %v665_v59 = vadd.f32 %v1220_v55, %v656_v56  ;;  %v657_v60 = vmul.f32 %v1219_v53, %v641_v58  ;;  %v1339_v61 = vpop.f32.mrb[3].mxu0 }
 0x192   : > { %v667_v62 = vmax.f32 %v665_v59, 0.0  ;;  %v666_v63 = vadd.f32 %v1220_v55, %v657_v60 }
 0x194   : > { %669 = vst [vmem:[#allocation3 + $0x1] sm:$0xff] %v667_v62  ;;  %v668_v1 = vmax.f32 %v666_v63, 0.0 }
 0x196   : > { %670 = vst [vmem:[#allocation3 + $0x9] sm:$0xff] %v668_v1  ;;  %v849_v3 = vpack.c.bf16 %v668_v1, %v667_v62 }
 0x198   : > { %1389 = vmatmul.mubr.bf16.vlgmr.msra.gmra.mrb[0].mxu1 %v849_v3 }
 0x199   : > { %1393 = vmatpush3.bf16.msra.mxu1 %v1547_v2  ;;  %1408 = vmatprep.mubr.msk.bf16.mxu1 %vm1754_vm1, %v1753_v0 }
 0x19a   : > { %1394 = vmatprep.subr.bf16.mxu1 %v1753_v0 }
 0x19b   : > { %v671_v5 = vld [vmem:[#allocation3] sm:$0xff] }
 0x19d   : > { %v672_v6 = vld [vmem:[#allocation3 + $0x8] sm:$0xff]  ;;  %1395 = vmatpush3.bf16.msra.mxu1 %v1548_v4 }
 0x19e   : > { %v673_v8 = vpack.c.bf16 %v672_v6, %v671_v5  ;;  %1396 = vmatprep.subr.bf16.mxu1 %v1753_v0  ;;  %v958_v14 = vld [vmem:[#allocation3 + $0x2] sm:$0xff]  ;;  %v959_v15 = vld [vmem:[#allocation3 + $0xa] sm:$0xff] }
 0x19f   : > { %v960_v16 = vpack.c.bf16 %v959_v15, %v958_v14 }
 0x1a0   : > { %1357 = vmatmul.mubr.bf16.vlgmr.msra.gmra.mrb[4].mxu0 %v673_v8 }
 0x1a1   : > { %1397 = vmatpush3.bf16.msra.mxu1 %v1549_v7 }
 0x1a2   : > { %1398 = vmatprep.subr.bf16.mxu1 %v1753_v0 }
 0x1a5   : > { %1399 = vmatpush3.bf16.msra.mxu1 %v1550_v9 }
 0x1a6   : > { %1400 = vmatprep.subr.bf16.mxu1 %v1753_v0 }
 0x1a9   : > { %1401 = vmatpush3.bf16.msra.mxu1 %v1551_v10 }
 0x1aa   : > { %1402 = vmatprep.subr.bf16.mxu1 %v1753_v0 }
 0x1ad   : > { %1403 = vmatpush3.bf16.msra.mxu1 %v1552_v11 }
 0x1ae   : > { %1404 = vmatprep.subr.bf16.mxu1 %v1753_v0 }
 0x1b1   : > { %1405 = vmatpush3.bf16.msra.mxu1 %v1553_v12 }
 0x1b2   : > { %1406 = vmatprep.subr.bf16.mxu1 %v1753_v0 }
 0x1b5   : > { %1407 = vmatpush3.bf16.msra.mxu1 %v1554_v13 }
 0x1b8   : > { %1409 = vmatmul.mubr.bf16.vlgmr.msra.gmra.mrb[0].mxu1 %v960_v16 }
 0x273   : > { %v772_v17 = vpop.f32.mrb[4].mxu0 }
 0x274   : > { %v1358_v18 = vpop.f32.mrb[5].mxu0 }
 0x275   : > { %v775_v19 = vpop.f32.mrb[6].mxu0 }
 0x276   : > { %v1359_v20 = vpop.f32.mrb[7].mxu0 }
 0x28b   : > { %v1060_v21 = vpop.f32.mrb[0].mxu1 }
 0x28c   : > { %v1412_v22 = vadd.f32 %v1060_v21, %v772_v17  ;;  %v1410_v0 = vpop.f32.mrb[1].mxu1 }
 0x28d   : > { %v1063_v23 = vpop.f32.mrb[2].mxu1 }
 0x28e   : > { %1069 = vst [vmem:[%s367_s16] sm:$0xff] %v1412_v22  ;;  %v1413_v24 = vadd.f32 %v1063_v23, %v775_v19  ;;  %v1411_v25 = vpop.f32.mrb[3].mxu1 }
 0x290   : > { %1070 = vst [vmem:[%s367_s16 + $0x8] sm:$0xff] %v1413_v24 }
 0x291   : > { %1682 = shalt.err (!%p1679_p4)
}
 0x292   : > { %s1683_s15 = scalar_lea.hbm %s2107_s11, 256  ;;  %s1687_s14 = scalar_lea.hbm %s2159_s8, 512 }
 0x293   : > { %p1684_p9 = scmp.ne.s32.totalorder %s2107_s11, %s1683_s15  ;;  %p1688_p8 = scmp.lt.u32.totalorder %s2107_s11, %s2159_s8 }
 0x294   : > { %p1689_p13 = scmp.lt.u32.totalorder %s1687_s14, %s1683_s15  ;;  %p1691_p10 = scmp.lt.u32.totalorder %s1683_s15, %s2107_s11 }
 0x295   : > { %p1685_p0 = pnand %p1684_p9, %p1957_p5 }
 0x296   : > { %p1690_p6 = por %p1689_p13, %p1688_p8 }
 0x297   : > { %p1686_p11 = pneg %p1685_p0 }
 0x298   : > { %p1692_p3 = por %p1691_p10, %p1690_p6 }
 0x29a   : > { %p1693_p7 = pnand %p1692_p3, %p1686_p11 }
 0x29c   : > { %1696 = shalt.err (!%p1693_p7)
}
 0x29d   : > { %s1756_s19 = smov 128   ;;  %s1757_s24 = smov 8  }
 0x29e   : > { %1444 = dma.vmem_to_hbm [thread:$0]  (%p1957_p5), %s2102_s27, 256, %s2107_s11, %s1072_s20, %s1756_s19, %s1756_s19, %s1757_s24  }
 0x29f PF: > { %s2181_s9 = sld [smem:[#allocation17_spill]]  ;;  %s2182_s13 = sld [smem:[#allocation18_spill]] }
 0x2a0   : > { %p2184_p1 = scmp.ge.s32.totalorder %s1743_s30, 2 }
 0x2a5   : > { %s1100_s10 = sand.u32 1, %s2181_s9   ;;  %p2183_p12 = scmp.ne.s32.totalorder %s2182_s13, 0 }
 0x2a6   : > { %s1101_s17 = scalar_lea.sflag [#allocation6], %s1100_s10 }
 0x2a7   : > { %p1461_p2 = pnand %p2184_p1, %p2183_p12 }
 0x2a9   : > { %1726 = dma.done.wait (!%p1461_p2), %s1101_s17, 256  }
 0x2aa   : > { %1728 = vsyncadd (!%p1461_p2), %s1101_s17, 4294967040  ;;  %p23_p4 = scmp.ge.s32.totalorder %s1943_s26, 4   ;;  %s2185_s27 = smov %s1735_s28 }
 0x2ab   : > { %s2186_s28 = smov %s1739_s29  ;;  %s2187_s29 = smov %s1953_s22 }
 0x2ac   : > { %s2188_s30 = smov %s1943_s26  ;;  %25 = sbr.rel (!%p23_p4) target bundleno = 7 (0x7), region = 113 }
 0x2b3   :  { %1106 = vsyncpa [#allocation5], 1 }
 0x2b4   :  { %1108 = vsyncpa [#allocation5 + $0x1], 1 }
 0x2b5   :  { %1109 = vsyncpa [#allocation8], 1 }
 0x2b6   :  { %1110 = vsyncpa [#allocation11], 1 }
 0x2b7   :  { %1111 = vsyncpa [#allocation6], 1 }
 0x2b8   :  { %1113 = vsyncpa [#allocation6 + $0x1], 1 }

</bundles_post_ra>
